<compile_context>
chip_gen: v7x
topology: tpu7x:2x2x1
jax: 0.10.0
libtpu: 0.0.40
codegen_flags: <defaults>
</compile_context>

<pallas_src>
import jax
import jax.numpy as jnp
from jax.experimental import pallas as pl
from jax.experimental.pallas import tpu as pltpu

EPS = 1e-5          # nn.BatchNorm1d default eps
NEG_SLOPE = 0.01    # nn.LeakyReLU default negative_slope


def conv_bn_act(x, weight, gamma, beta, *, k=1, s=1, p=0):
    """x: (N, C1, L) f32; weight: (C2, C1, K); gamma/beta: (C2,). Returns (N, C2, L_out).

    Matches PyTorch training-mode forward: Conv1d(bias=False) -> BatchNorm1d -> LeakyReLU.
    """
    n, c1, l = x.shape
    c2 = weight.shape[0]
    l_out = (l + 2 * p - k) // s + 1
    l_in = l + 2 * p

    # --- tiny JAX glue: zero-pad the conv halo; per-tap weight layout (K, C2, C1) ---
    x_pad = jnp.pad(x.astype(jnp.float32), ((0, 0), (0, 0), (p, p)))      # (N, C1, L+2p)
    w_t = jnp.transpose(weight.astype(jnp.float32), (2, 0, 1))            # (K, C2, C1)

    def conv_row(x_ref, w_ref):
        """Direct conv for one batch row: sum_k W_k @ x[:, k : k + L_out*s : s]."""
        acc = jnp.zeros((c2, l_out), jnp.float32)
        for kk in range(k):                      # static, unrolled tap loop
            if s == 1:
                xw = x_ref[0, :, pl.ds(kk, l_out)]
            else:
                xw = x_ref[0, :, pl.ds(kk, l_out, stride=s)]
            acc = acc + jnp.dot(w_ref[kk], xw, preferred_element_type=jnp.float32)
        return acc

    def stats_kernel(x_ref, w_ref, mean_ref, m2_ref):
        y = conv_row(x_ref, w_ref)                                  # (C2, L_out), VMEM only
        mb = jnp.sum(y, axis=1, keepdims=True) * (1.0 / l_out)      # per-row channel mean
        m2 = jnp.sum((y - mb) ** 2, axis=1, keepdims=True)          # per-row channel M2
        mean_ref[0] = mb
        m2_ref[0] = m2

    def apply_kernel(x_ref, w_ref, scale_ref, shift_ref, o_ref):
        y = conv_row(x_ref, w_ref)
        z = y * scale_ref[...] + shift_ref[...]                     # folded BN: one FMA
        o_ref[0] = jnp.where(z >= 0, z, NEG_SLOPE * z).astype(o_ref.dtype)

    # ---- Pass 1: per-batch-row partial stats (parallel over rows) ----
    row_mean, row_m2 = pl.pallas_call(
        stats_kernel,
        out_shape=(jax.ShapeDtypeStruct((n, c2, 1), jnp.float32),
                   jax.ShapeDtypeStruct((n, c2, 1), jnp.float32)),
        grid=(n,),
        in_specs=[
            pl.BlockSpec((1, c1, l_in), lambda i: (i, 0, 0)),
            pl.BlockSpec((k, c2, c1), lambda i: (0, 0, 0)),
        ],
        out_specs=(
            pl.BlockSpec((1, c2, 1), lambda i: (i, 0, 0)),
            pl.BlockSpec((1, c2, 1), lambda i: (i, 0, 0)),
        ),
        compiler_params=pltpu.CompilerParams(dimension_semantics=("parallel",)),
    )(x_pad, w_t)

    # ---- Finalize BN stats (numerically stable pooled merge) -> per-channel FMA ----
    rm = row_mean[:, :, 0]                                    # (N, C2)
    rM2 = row_m2[:, :, 0]                                     # (N, C2)
    mean = jnp.mean(rm, axis=0)                               # (C2,)
    ss = jnp.sum(rM2, axis=0) + l_out * jnp.sum((rm - mean) ** 2, axis=0)
    var = ss / (n * l_out)                                    # biased var (BN training mode)
    inv = jax.lax.rsqrt(var + EPS)
    g32 = gamma.astype(jnp.float32)
    scale = (g32 * inv).reshape(c2, 1)
    shift = (beta.astype(jnp.float32) - mean * g32 * inv).reshape(c2, 1)

    # ---- Pass 2: recompute conv (cheap; pipeline is HBM-bound) + BN + LeakyReLU ----
    out = pl.pallas_call(
        apply_kernel,
        out_shape=jax.ShapeDtypeStruct((n, c2, l_out), x.dtype),
        grid=(n,),
        in_specs=[
            pl.BlockSpec((1, c1, l_in), lambda i: (i, 0, 0)),
            pl.BlockSpec((k, c2, c1), lambda i: (0, 0, 0)),
            pl.BlockSpec((c2, 1), lambda i: (0, 0)),
            pl.BlockSpec((c2, 1), lambda i: (0, 0)),
        ],
        out_specs=pl.BlockSpec((1, c2, l_out), lambda i: (i, 0, 0)),
        compiler_params=pltpu.CompilerParams(dimension_semantics=("parallel",)),
    )(x_pad, w_t, scale, shift)

    # TODO(synk): for very long sequences, tile L inside each row (halo'd window via a
    # second shifted BlockSpec view or manual DMA) instead of holding a full row in VMEM.
    return out


def reference(x, weight, gamma, beta, *, k, s, p):
    """Pure-JAX reference matching PyTorch training-mode forward."""
    y = jax.lax.conv_general_dilated(
        x, weight, window_strides=(s,), padding=[(p, p)],
        dimension_numbers=("NCH", "OIH", "NCH"))
    mean = jnp.mean(y, axis=(0, 2), keepdims=True)
    var = jnp.mean((y - mean) ** 2, axis=(0, 2), keepdims=True)
    z = (y - mean) * jax.lax.rsqrt(var + EPS)
    z = z * gamma[None, :, None] + beta[None, :, None]
    return jnp.where(z >= 0, z, NEG_SLOPE * z)


if __name__ == "__main__":
    # Small shapes consistent with the module: Conv(c1=4, c2=8, k=3, s=1, p=1)
    N, C1, C2, L, K, S, P = 2, 4, 8, 16, 3, 1, 1

    key = jax.random.PRNGKey(0)
    kx, kw = jax.random.split(key)
    x = jax.random.normal(kx, (N, C1, L), dtype=jnp.float32)
    weight = jax.random.normal(kw, (C2, C1, K), dtype=jnp.float32) * 0.1
    gamma = jnp.ones((C2,), jnp.float32)   # PyTorch BatchNorm1d default init
    beta = jnp.zeros((C2,), jnp.float32)

    out = conv_bn_act(x, weight, gamma, beta, k=K, s=S, p=P)
    out = jax.block_until_ready(out)

    ref = reference(x, weight, gamma, beta, k=K, s=S, p=P)
    assert out.shape == (N, C2, L), out.shape
    assert jnp.allclose(out, ref, atol=1e-3, rtol=1e-3), float(jnp.max(jnp.abs(out - ref)))

    print("KERNEL_OK")
</pallas_src>

<mosaic_0001>
module attributes {stable_mosaic.version = 11 : i64} {
  func.func @stats_kernel(%arg0: i32, %arg1: memref<1x4x18xf32, #tpu.memory_space<vmem>>, %arg2: memref<3x8x4xf32, #tpu.memory_space<vmem>>, %arg3: memref<1x8x1xf32, #tpu.memory_space<vmem>>, %arg4: memref<1x8x1xf32, #tpu.memory_space<vmem>>) attributes {dimension_semantics = [#tpu.dimension_semantics<parallel>], iteration_bounds = array<i64: 2>, scalar_prefetch = 0 : i64, scratch_operands = 0 : i64, tpu.core_type = #tpu.core_type<tc>, window_params = [{transform_indices = @transform_0, window_bounds = array<i64: 1, 4, 18>}, {pipeline_mode = #tpu.pipeline_mode<synchronous>, transform_indices = @transform_1, window_bounds = array<i64: 3, 8, 4>}, {transform_indices = @transform_2, window_bounds = array<i64: 1, 8, 1>}, {transform_indices = @transform_3, window_bounds = array<i64: 1, 8, 1>}]} {
    %cst = arith.constant 0.000000e+00 : f32
    %0 = vector.broadcast %cst : f32 to vector<8x16xf32>
    %c0 = arith.constant 0 : index
    %c0_0 = arith.constant 0 : index
    %c0_1 = arith.constant 0 : index
    %1 = vector.load %arg1[%c0, %c0_0, %c0_1] : memref<1x4x18xf32, #tpu.memory_space<vmem>>, vector<1x4x16xf32>
    %2 = vector.shape_cast %1 : vector<1x4x16xf32> to vector<4x16xf32>
    %c0_2 = arith.constant 0 : index
    %c0_3 = arith.constant 0 : index
    %c0_4 = arith.constant 0 : index
    %3 = vector.load %arg2[%c0_2, %c0_3, %c0_4] : memref<3x8x4xf32, #tpu.memory_space<vmem>>, vector<1x8x4xf32>
    %4 = vector.shape_cast %3 : vector<1x8x4xf32> to vector<8x4xf32>
    %cst_5 = arith.constant dense<0.000000e+00> : vector<8x16xf32>
    %5 = tpu.matmul %4, %2, %cst_5 {dimension_numbers = #tpu.dot_dimension_numbers<[1], [0], [0], [1], [0, 0, 1, 1], [], []>} : vector<8x4xf32>, vector<4x16xf32>, vector<8x16xf32> -> vector<8x16xf32>
    %6 = arith.addf %0, %5 : vector<8x16xf32>
    %c0_6 = arith.constant 0 : index
    %c0_7 = arith.constant 0 : index
    %c1 = arith.constant 1 : index
    %7 = vector.load %arg1[%c0_6, %c0_7, %c1] : memref<1x4x18xf32, #tpu.memory_space<vmem>>, vector<1x4x16xf32>
    %8 = vector.shape_cast %7 : vector<1x4x16xf32> to vector<4x16xf32>
    %c1_8 = arith.constant 1 : index
    %c0_9 = arith.constant 0 : index
    %c0_10 = arith.constant 0 : index
    %9 = vector.load %arg2[%c1_8, %c0_9, %c0_10] : memref<3x8x4xf32, #tpu.memory_space<vmem>>, vector<1x8x4xf32>
    %10 = vector.shape_cast %9 : vector<1x8x4xf32> to vector<8x4xf32>
    %cst_11 = arith.constant dense<0.000000e+00> : vector<8x16xf32>
    %11 = tpu.matmul %10, %8, %cst_11 {dimension_numbers = #tpu.dot_dimension_numbers<[1], [0], [0], [1], [0, 0, 1, 1], [], []>} : vector<8x4xf32>, vector<4x16xf32>, vector<8x16xf32> -> vector<8x16xf32>
    %12 = arith.addf %6, %11 : vector<8x16xf32>
    %c0_12 = arith.constant 0 : index
    %c0_13 = arith.constant 0 : index
    %c2 = arith.constant 2 : index
    %13 = vector.load %arg1[%c0_12, %c0_13, %c2] : memref<1x4x18xf32, #tpu.memory_space<vmem>>, vector<1x4x16xf32>
    %14 = vector.shape_cast %13 : vector<1x4x16xf32> to vector<4x16xf32>
    %c2_14 = arith.constant 2 : index
    %c0_15 = arith.constant 0 : index
    %c0_16 = arith.constant 0 : index
    %15 = vector.load %arg2[%c2_14, %c0_15, %c0_16] : memref<3x8x4xf32, #tpu.memory_space<vmem>>, vector<1x8x4xf32>
    %16 = vector.shape_cast %15 : vector<1x8x4xf32> to vector<8x4xf32>
    %cst_17 = arith.constant dense<0.000000e+00> : vector<8x16xf32>
    %17 = tpu.matmul %16, %14, %cst_17 {dimension_numbers = #tpu.dot_dimension_numbers<[1], [0], [0], [1], [0, 0, 1, 1], [], []>} : vector<8x4xf32>, vector<4x16xf32>, vector<8x16xf32> -> vector<8x16xf32>
    %18 = arith.addf %12, %17 : vector<8x16xf32>
    %cst_18 = arith.constant dense<0.000000e+00> : vector<8xf32>
    %19 = vector.multi_reduction <add>, %18, %cst_18 [1] : vector<8x16xf32> to vector<8xf32>
    %20 = vector.shape_cast %19 : vector<8xf32> to vector<8x1xf32>
    %cst_19 = arith.constant 6.250000e-02 : f32
    %21 = vector.broadcast %cst_19 : f32 to vector<8x1xf32>
    %22 = arith.mulf %20, %21 : vector<8x1xf32>
    %23 = vector.broadcast %22 : vector<8x1xf32> to vector<8x16xf32>
    %24 = arith.subf %18, %23 : vector<8x16xf32>
    %25 = arith.mulf %24, %24 : vector<8x16xf32>
    %cst_20 = arith.constant dense<0.000000e+00> : vector<8xf32>
    %26 = vector.multi_reduction <add>, %25, %cst_20 [1] : vector<8x16xf32> to vector<8xf32>
    %27 = vector.shape_cast %26 : vector<8xf32> to vector<8x1xf32>
    %c0_21 = arith.constant 0 : index
    %c0_22 = arith.constant 0 : index
    %c0_23 = arith.constant 0 : index
    %28 = vector.load %arg3[%c0_21, %c0_22, %c0_23] : memref<1x8x1xf32, #tpu.memory_space<vmem>>, vector<1x8x1xf32>
    %29 = vector.shape_cast %28 : vector<1x8x1xf32> to vector<8x1xf32>
    %30 = vector.shape_cast %22 : vector<8x1xf32> to vector<1x8x1xf32>
    tpu.vector_store %arg3[%c0_21, %c0_22, %c0_23], %30 {strides = array<i32>} : memref<1x8x1xf32, #tpu.memory_space<vmem>>, vector<1x8x1xf32>,
    %c0_24 = arith.constant 0 : index
    %c0_25 = arith.constant 0 : index
    %c0_26 = arith.constant 0 : index
    %31 = vector.load %arg4[%c0_24, %c0_25, %c0_26] : memref<1x8x1xf32, #tpu.memory_space<vmem>>, vector<1x8x1xf32>
    %32 = vector.shape_cast %31 : vector<1x8x1xf32> to vector<8x1xf32>
    %33 = vector.shape_cast %27 : vector<8x1xf32> to vector<1x8x1xf32>
    tpu.vector_store %arg4[%c0_24, %c0_25, %c0_26], %33 {strides = array<i32>} : memref<1x8x1xf32, #tpu.memory_space<vmem>>, vector<1x8x1xf32>,
    return
  }
  func.func @transform_0(%arg0: i32) -> (i32, i32, i32) {
    %c0_i32 = arith.constant 0 : i32
    %c0_i32_0 = arith.constant 0 : i32
    %c0_i32_1 = arith.constant 0 : i32
    return %arg0, %c0_i32, %c0_i32_0 : i32, i32, i32
  }
  func.func @transform_1(%arg0: i32) -> (i32, i32, i32) {
    %c0_i32 = arith.constant 0 : i32
    %c0_i32_0 = arith.constant 0 : i32
    %c0_i32_1 = arith.constant 0 : i32
    %c0_i32_2 = arith.constant 0 : i32
    return %c0_i32, %c0_i32_0, %c0_i32_1 : i32, i32, i32
  }
  func.func @transform_2(%arg0: i32) -> (i32, i32, i32) {
    %c0_i32 = arith.constant 0 : i32
    %c0_i32_0 = arith.constant 0 : i32
    %c0_i32_1 = arith.constant 0 : i32
    return %arg0, %c0_i32, %c0_i32_0 : i32, i32, i32
  }
  func.func @transform_3(%arg0: i32) -> (i32, i32, i32) {
    %c0_i32 = arith.constant 0 : i32
    %c0_i32_0 = arith.constant 0 : i32
    %c0_i32_1 = arith.constant 0 : i32
    return %arg0, %c0_i32, %c0_i32_0 : i32, i32, i32
  }
}

</mosaic_0001>

<bundles_post_ra>
// kernel: tpu_custom_call.1
= control target key start
LH: loop header
LB: loop body
LE: loop exit
PB: predicated region body
PF: predicated region fallthrough
CT: control target
= control target key end

     0   :  { %s599_s12 = smov 0   ;;  %s641_s0 = inlined_call_operand.vmem [shape: f32[2,4,18], index: 0, kind: input, shape index: {}]   ;;  %s642_s1 = inlined_call_operand.vmem [shape: f32[3,8,4], index: 1, kind: input, shape index: {}]   ;;  %s643_s2 = inlined_call_operand.vmem [shape: f32[2,8,1], index: 2, kind: output, shape index: {0}]   ;;  %s644_s3 = inlined_call_operand.vmem [shape: f32[2,8,1], index: 3, kind: output, shape index: {1}]  }
   0x1 LB: > { %s513_s13 = sadd.s32 4294967295, %s573_s12   ;;  %p517_p0 = scmp.ge.s32.totalorder %s573_s12, 1  ;;  %s573_s12 = sphi %s599_s12, %s14_s12  }
   0x2   : > { %p139_p1 = scmp.lt.s32.totalorder %s573_s12, 3 }
   0x4   : > { %p140_p2 = pnand %p517_p0, %p139_p1 }
   0x5   : > { %p165_p3 = scmp.lt.s32.totalorder (!%p140_p2), %s513_s13, 1  ;;  %v575_v0 = vmov (!%p140_p2), 0.0   ;;  %vm576_vm0 = vmmov (!%p140_p2), 0   ;;  %vm188_vm1 = vcmask (!%p140_p2), 1043456   ;;  %v178_v1 = vld [vmem:[%s642_s1] sm:$0xff] (!%p140_p2)  ;;  %vm184_vm2 = vcmask (!%p140_p2), 31744  }
   0x6   : > { %143 = sbr.rel (%p140_p2) target bundleno = 644 (0x284), region = 28  ;;  %542 = vmatprep.subr.mxu0 (!%p140_p2), %v575_v0  ;;  %544 = vmatprep.mubr.msk.f32.mxu0 (!%p140_p2), %vm576_vm0, %v575_v0  ;;  %s577_s20 = smov (!%p140_p2), 127   ;;  %v521_v3 = vld [vmem:[%s642_s1 + $0x8] sm:$0xff] (!%p140_p2)  ;;  %v526_v5 = vld [vmem:[%s642_s1 + $0x10] sm:$0xff] (!%p140_p2)  ;;  %vm416_vm3 = vcmask (!%p140_p2), 130048   ;;  %vm426_vm4 = vcmask (!%p140_p2), 7168  }
   0x7   : > { %537 = vmatprep.subr.mxu1 (!%p140_p2), %v575_v0  ;;  %539 = vmatprep.mubr.msk.f32.mxu1 (!%p140_p2), %vm576_vm0, %v575_v0  ;;  %s578_s21 = smov (!%p140_p2), 126  }
   0xd   : > { %s646_s13 = smov (!%p165_p3, %s513_s13), 1 }
   0xe   : > { %s518_s14 = sshll.u32 %s646_s13, 2  ;;  %s519_s26 = sshll.u32 %s646_s13, 3 }
   0xf   : > { %s168_s17 = scalar_lea.vmem %s641_s0, %s518_s14  ;;  %s172_s29 = scalar_lea.vmem %s643_s2, %s519_s26 }
  0x10   : > { %v177_v2 = vld [vmem:[%s168_s17] sm:$0xf]  ;;  %s176_s5 = scalar_lea.vmem %s644_s3, %s519_s26 }
  0x11   : > { %182 = vrot.lane.b32.xlu0 %v177_v2, %s577_s20  ;;  %543 = vmatpush3.msk.msra.mxu0 %vm188_vm1, %v177_v2 }
  0x12   : > { %545 = vmatmul.mubr.msk.f32.vlgmr.msra.gmra.mrb[0].mxu0 %vm184_vm2, %v178_v1  ;;  %547 = vmatprep.subr.mxu0 %v575_v0 }
  0x13   : > { %549 = vmatprep.mubr.msk.f32.mxu0 %vm576_vm0, %v575_v0 }
  0x15   : > { %338 = vrot.lane.b32.xlu0 %v177_v2, %s578_s21 }
  0x83   : > { %v183_v4 = vpop.permute.xlu0 %182 }
  0x84   : > { %538 = vmatpush3.msk.msra.mxu1 %vm188_vm1, %v183_v4 }
  0x85   : > { %540 = vmatmul.mubr.msk.f32.vlgmr.msra.gmra.mrb[0].mxu1 %vm184_vm2, %v521_v3 }
  0x87   : > { %v339_v6 = vpop.permute.xlu0 %338 }
  0x88   : > { %548 = vmatpush3.msk.msra.mxu0 %vm188_vm1, %v339_v6 }
  0x89   : > { %550 = vmatmul.mubr.msk.f32.vlgmr.msra.gmra.mrb[0].mxu0 %vm184_vm2, %v526_v5 }
 0x158   : > { %v257_v7 = vpop.f32.mrb[0].mxu1 }
 0x159   : > { %v541_v8 = vpop.f32.mrb[1].mxu1 }
 0x15c   : > { %v411_v9 = vpop.f32.mrb[0].mxu0 }
 0x15d   : > { %v552_v10 = vadd.f32 %v411_v9, %v257_v7  ;;  %v551_v11 = vpop.f32.mrb[1].mxu0 }
 0x15f   : > { %v417_v12 = vsel %vm416_vm3, %v552_v10, 0.0 }
 0x160   : > { %418 = vadd.xlane.f32.xlu1 %v417_v12 }
 0x1ed   : > { %v419_v13 = vpop.xlane.xlu1 %418 }
 0x1ee   : > { %v420_v14 = vmul.f32 0.0625, %v419_v13 }
 0x1f0   : > { %v421_v15 = vsub.f32 %v552_v10, %v420_v14  ;;  %427 = vst.msk [vmem:[%s172_s29] sm:$0xff] %vm426_vm4, %v420_v14 }
 0x1f2   : > { %v422_v16 = vmul.f32 %v421_v15, %v421_v15 }
 0x1f4   : > { %v423_v17 = vsel %vm416_vm3, %v422_v16, 0.0 }
 0x1f5   : > { %424 = vadd.xlane.f32.xlu1 %v423_v17 }
 0x282   : > { %v425_v18 = vpop.xlane.xlu1 %424 }
 0x283   : > { %428 = vst.msk [vmem:[%s176_s5] sm:$0xff] %vm426_vm4, %v425_v18 }
 0x284 PF: > { %s14_s12 = sadd.s32 1, %s573_s12  }
 0x285   : > { %p11_p4 = scmp.ge.s32.totalorder %s14_s12, 4  }
 0x287   :  { %13 = sbr.rel (!%p11_p4) target bundleno = 1 (0x1), region = 72 }

</bundles_post_ra>
